<compile_context>
chip_gen: v7x
topology: tpu7x:2x2x1
jax: 0.10.0
libtpu: 0.0.40
codegen_flags: <defaults>
</compile_context>

<pallas_src>
import functools

import jax
import jax.numpy as jnp
from jax.experimental import pallas as pl
from jax.experimental.pallas import tpu as pltpu

_LANES = 128
_SUBLANES = 8


def _round_up(v, m):
    return ((v + m - 1) // m) * m


def _int_pow(base, g):
    """base**g. Integer g -> exponentiation by squaring (pure VPU multiplies,
    matches torch.pow incl. pow(0., 0.) == 1). Non-integer g -> jnp.power."""
    gf = float(g)
    if gf == 0.0:
        return jnp.ones_like(base)
    if gf > 0 and gf == int(gf) and int(gf) <= 32:
        n = int(gf)
        result = None
        cur = base
        while n:
            if n & 1:
                result = cur if result is None else result * cur
            n >>= 1
            if n:
                cur = cur * cur
        return result
    return jnp.power(base, gf)


def _asl_kernel(x_ref, y_ref, o_ref, acc_ref, *, gamma_neg, gamma_pos, clip, eps):
    s = pl.program_id(1)

    @pl.when(s == 0)
    def _():
        acc_ref[...] = jnp.zeros_like(acc_ref)

    x = x_ref[...].astype(jnp.float32)
    y = y_ref[...].astype(jnp.float32)
    is_pos = y > 0.0

    xs_pos = jax.nn.sigmoid(x)
    xs_neg = 1.0 - xs_pos
    xs_neg_c = xs_neg
    if clip is not None and clip > 0:
        xs_neg_c = jnp.minimum(xs_neg + clip, 1.0)

    # y is a binarized multi-label target, so
    #   y*log(xs_pos) + (1-y)*log(xs_neg_clipped) == log(selected prob)
    # -> one EUP log per element instead of two.
    p = jnp.where(is_pos, xs_pos, xs_neg_c)
    base = jnp.log(jnp.maximum(p, eps))

    if gamma_neg > 0 or gamma_pos > 0:
        # (1 - pt) is (1 - xs_pos) for positives and (1 - xs_neg_clipped) for
        # negatives. Integer gammas are pure VPU multiplies (no exp/log).
        # TODO(synk): forward-only; the torch.no_grad() around the focal weight
        # would need stop_gradient in a custom_vjp if a backward pass is added.
        w_pos = _int_pow(xs_neg, gamma_pos)          # == (1 - xs_pos)**gamma_pos
        w_neg = _int_pow(1.0 - xs_neg_c, gamma_neg)
        loss = base * jnp.where(is_pos, w_pos, w_neg)
    else:
        loss = base

    # Fold (block_rows, 128) -> (8, 128) with VPU adds only; the final
    # cross-lane/sublane reduce is deferred to the wrapper.
    acc_ref[...] += jnp.sum(loss.reshape(-1, _SUBLANES, _LANES), axis=0)

    @pl.when(s == pl.num_programs(1) - 1)
    def _():
        o_ref[...] = -acc_ref[...]


def asymmetric_loss(x, y, *, gamma_neg=4, gamma_pos=1, clip=0.05, eps=1e-8,
                    max_block_rows=4096, num_partials=2):
    """Pallas TPU implementation of AsymmetricLoss.forward(x, y) -> scalar."""
    assert x.shape == y.shape

    total = x.size
    xf = x.reshape(-1)
    # Binary {0, 1} targets are exact in bf16 -> halve y's HBM traffic.
    yf = y.reshape(-1).astype(jnp.bfloat16)

    # Lane-dense layout: (rows, 128). block_rows sized for VMEM (<= 2 MiB f32).
    rows = pl.cdiv(total, _LANES)
    rows_per_core = pl.cdiv(rows, num_partials)
    block_rows = min(max_block_rows, _round_up(rows_per_core, _SUBLANES))
    rows_padded = _round_up(rows, num_partials * block_rows)
    padded_total = rows_padded * _LANES
    if padded_total != total:
        pad = padded_total - total
        # Pad with (x=+40, y=1): sigmoid(40) == 1.0 in f32, so both the log term
        # and the focal weight are exactly 0 -> padding contributes nothing.
        xf = jnp.concatenate([xf, jnp.full((pad,), 40.0, dtype=xf.dtype)])
        yf = jnp.concatenate([yf, jnp.ones((pad,), dtype=yf.dtype)])
    x2 = xf.reshape(rows_padded, _LANES)
    y2 = yf.reshape(rows_padded, _LANES)

    steps = rows_padded // (num_partials * block_rows)

    kernel = functools.partial(
        _asl_kernel,
        gamma_neg=float(gamma_neg),
        gamma_pos=float(gamma_pos),
        clip=clip,
        eps=float(eps),
    )

    bytes_accessed = (x2.size * x2.dtype.itemsize
                      + y2.size * y2.dtype.itemsize
                      + num_partials * _SUBLANES * _LANES * 4)
    cost = pl.CostEstimate(flops=15 * padded_total,
                           transcendentals=2 * padded_total,
                           bytes_accessed=bytes_accessed)

    out = pl.pallas_call(
        kernel,
        out_shape=jax.ShapeDtypeStruct((num_partials, _SUBLANES, _LANES),
                                       jnp.float32),
        grid_spec=pltpu.PrefetchScalarGridSpec(
            num_scalar_prefetch=0,
            grid=(num_partials, steps),
            in_specs=[
                pl.BlockSpec((block_rows, _LANES), lambda c, s: (c * steps + s, 0)),
                pl.BlockSpec((block_rows, _LANES), lambda c, s: (c * steps + s, 0)),
            ],
            out_specs=pl.BlockSpec((None, _SUBLANES, _LANES),
                                   lambda c, s: (c, 0, 0)),
            scratch_shapes=[pltpu.VMEM((_SUBLANES, _LANES), jnp.float32)],
        ),
        compiler_params=pltpu.CompilerParams(
            dimension_semantics=("parallel", "arbitrary"),
            vmem_limit_bytes=32 * 1024 * 1024),
        cost_estimate=cost,
    )(x2, y2)

    # Final reduce of the tiny per-core (8, 128) partials outside the kernel.
    return jnp.sum(out)


def _asymmetric_loss_ref(x, y, gamma_neg=4, gamma_pos=1, clip=0.05, eps=1e-8):
    """Pure-JAX reference mirroring the PyTorch forward."""
    x = x.astype(jnp.float32)
    y = y.astype(jnp.float32)
    xs_pos = jax.nn.sigmoid(x)
    xs_neg = 1.0 - xs_pos
    if clip is not None and clip > 0:
        xs_neg = jnp.minimum(xs_neg + clip, 1.0)
    los_pos = y * jnp.log(jnp.maximum(xs_pos, eps))
    los_neg = (1.0 - y) * jnp.log(jnp.maximum(xs_neg, eps))
    loss = los_pos + los_neg
    pt = xs_pos * y + xs_neg * (1.0 - y)
    gamma = gamma_pos * y + gamma_neg * (1.0 - y)
    loss = loss * jnp.power(1.0 - pt, gamma)
    return -jnp.sum(loss)


if __name__ == "__main__":
    key = jax.random.PRNGKey(0)
    kx, ky = jax.random.split(key)

    # multi-label logits / binarized targets
    B, C = 16, 128
    x = jax.random.normal(kx, (B, C), dtype=jnp.float32)
    y = (jax.random.uniform(ky, (B, C)) > 0.7).astype(jnp.float32)

    out = jax.block_until_ready(asymmetric_loss(x, y))
    ref = _asymmetric_loss_ref(x, y)
    assert jnp.allclose(out, ref, rtol=1e-4, atol=1e-3), (out, ref)

    # also exercise the padding path (class count not a multiple of 128)
    B2, C2 = 7, 80
    x2 = jax.random.normal(kx, (B2, C2), dtype=jnp.float32)
    y2 = (jax.random.uniform(ky, (B2, C2)) > 0.6).astype(jnp.float32)
    out2 = jax.block_until_ready(asymmetric_loss(x2, y2))
    ref2 = _asymmetric_loss_ref(x2, y2)
    assert jnp.allclose(out2, ref2, rtol=1e-4, atol=1e-3), (out2, ref2)

    print("KERNEL_OK")
</pallas_src>

<mosaic_0001>
module attributes {stable_mosaic.version = 11 : i64} {
  func.func @_asl_kernel(%arg0: i32, %arg1: i32, %arg2: memref<8x128xf32, #tpu.memory_space<vmem>>, %arg3: memref<8x128xbf16, #tpu.memory_space<vmem>>, %arg4: memref<1x8x128xf32, #tpu.memory_space<vmem>>, %arg5: memref<8x128xf32, #tpu.memory_space<vmem>>) attributes {dimension_semantics = [#tpu.dimension_semantics<parallel>, #tpu.dimension_semantics<arbitrary>], iteration_bounds = array<i64: 2, 1>, scalar_prefetch = 0 : i64, scratch_operands = 1 : i64, tpu.core_type = #tpu.core_type<tc>, window_params = [{transform_indices = @transform_0, window_bounds = array<i64: 8, 128>}, {transform_indices = @transform_1, window_bounds = array<i64: 8, 128>}, {transform_indices = @transform_2, window_bounds = array<i64: 1, 8, 128>}]} {
    %c0_i32 = arith.constant 0 : i32
    %0 = arith.cmpi eq, %arg1, %c0_i32 : i32
    %1 = arith.extui %0 : i1 to i32
    %c0_i32_0 = arith.constant 0 : i32
    %2 = arith.cmpi ne, %1, %c0_i32_0 : i32
    scf.if %2 {
      %cst_17 = arith.constant 0.000000e+00 : f32
      %37 = vector.broadcast %cst_17 : f32 to vector<8x128xf32>
      %c0_18 = arith.constant 0 : index
      %c0_19 = arith.constant 0 : index
      %38 = vector.load %arg5[%c0_18, %c0_19] : memref<8x128xf32, #tpu.memory_space<vmem>>, vector<8x128xf32>
      tpu.vector_store %arg5[%c0_18, %c0_19], %37 {strides = array<i32>} : memref<8x128xf32, #tpu.memory_space<vmem>>, vector<8x128xf32>,
    } else {
    }
    %c0 = arith.constant 0 : index
    %c0_1 = arith.constant 0 : index
    %3 = vector.load %arg2[%c0, %c0_1] : memref<8x128xf32, #tpu.memory_space<vmem>>, vector<8x128xf32>
    %c0_2 = arith.constant 0 : index
    %c0_3 = arith.constant 0 : index
    %4 = vector.load %arg3[%c0_2, %c0_3] : memref<8x128xbf16, #tpu.memory_space<vmem>>, vector<8x128xbf16>
    %5 = arith.extf %4 : vector<8x128xbf16> to vector<8x128xf32>
    %cst = arith.constant 0.000000e+00 : f32
    %6 = vector.broadcast %cst : f32 to vector<8x128xf32>
    %7 = arith.cmpf ogt, %5, %6 : vector<8x128xf32>
    %8 = arith.negf %3 : vector<8x128xf32>
    %9 = math.exp %8 : vector<8x128xf32>
    %cst_4 = arith.constant 1.000000e+00 : f32
    %10 = vector.broadcast %cst_4 : f32 to vector<8x128xf32>
    %11 = arith.addf %10, %9 : vector<8x128xf32>
    %12 = arith.divf %10, %11 : vector<8x128xf32>
    %cst_5 = arith.constant 1.000000e+00 : f32
    %13 = vector.broadcast %cst_5 : f32 to vector<8x128xf32>
    %14 = arith.subf %13, %12 : vector<8x128xf32>
    %cst_6 = arith.constant 5.000000e-02 : f32
    %15 = vector.broadcast %cst_6 : f32 to vector<8x128xf32>
    %16 = arith.addf %14, %15 : vector<8x128xf32>
    %cst_7 = arith.constant 1.000000e+00 : f32
    %17 = vector.broadcast %cst_7 : f32 to vector<8x128xf32>
    %18 = arith.minimumf %16, %17 : vector<8x128xf32>
    %19 = arith.select %7, %12, %18 : vector<8x128xi1>, vector<8x128xf32>
    %cst_8 = arith.constant 9.99999993E-9 : f32
    %20 = vector.broadcast %cst_8 : f32 to vector<8x128xf32>
    %21 = arith.maximumf %19, %20 : vector<8x128xf32>
    %22 = math.log %21 : vector<8x128xf32>
    %cst_9 = arith.constant 1.000000e+00 : f32
    %23 = vector.broadcast %cst_9 : f32 to vector<8x128xf32>
    %24 = arith.subf %23, %18 : vector<8x128xf32>
    %25 = arith.mulf %24, %24 : vector<8x128xf32>
    %26 = arith.mulf %25, %25 : vector<8x128xf32>
    %27 = arith.select %7, %14, %26 : vector<8x128xi1>, vector<8x128xf32>
    %28 = arith.mulf %22, %27 : vector<8x128xf32>
    %c0_10 = arith.constant 0 : index
    %c0_11 = arith.constant 0 : index
    %29 = vector.load %arg5[%c0_10, %c0_11] : memref<8x128xf32, #tpu.memory_space<vmem>>, vector<8x128xf32>
    %30 = vector.shape_cast %28 : vector<8x128xf32> to vector<1x8x128xf32>
    %cst_12 = arith.constant dense<0.000000e+00> : vector<8x128xf32>
    %31 = vector.multi_reduction <add>, %30, %cst_12 [0] : vector<1x8x128xf32> to vector<8x128xf32>
    %32 = arith.addf %29, %31 : vector<8x128xf32>
    %c0_13 = arith.constant 0 : index
    %c0_14 = arith.constant 0 : index
    %33 = vector.load %arg5[%c0_13, %c0_14] : memref<8x128xf32, #tpu.memory_space<vmem>>, vector<8x128xf32>
    tpu.vector_store %arg5[%c0_13, %c0_14], %32 {strides = array<i32>} : memref<8x128xf32, #tpu.memory_space<vmem>>, vector<8x128xf32>,
    %c0_i32_15 = arith.constant 0 : i32
    %34 = arith.cmpi eq, %arg1, %c0_i32_15 : i32
    %35 = arith.extui %34 : i1 to i32
    %c0_i32_16 = arith.constant 0 : i32
    %36 = arith.cmpi ne, %35, %c0_i32_16 : i32
    scf.if %36 {
      %c0_17 = arith.constant 0 : index
      %c0_18 = arith.constant 0 : index
      %37 = vector.load %arg5[%c0_17, %c0_18] : memref<8x128xf32, #tpu.memory_space<vmem>>, vector<8x128xf32>
      %cst_19 = arith.constant 0.000000e+00 : f32
      %38 = vector.broadcast %cst_19 : f32 to vector<8x128xf32>
      %39 = arith.subf %38, %37 : vector<8x128xf32>
      %c0_20 = arith.constant 0 : index
      %c0_21 = arith.constant 0 : index
      %c0_22 = arith.constant 0 : index
      %40 = vector.load %arg4[%c0_20, %c0_21, %c0_22] : memref<1x8x128xf32, #tpu.memory_space<vmem>>, vector<1x8x128xf32>
      %41 = vector.shape_cast %40 : vector<1x8x128xf32> to vector<8x128xf32>
      %42 = vector.shape_cast %39 : vector<8x128xf32> to vector<1x8x128xf32>
      tpu.vector_store %arg4[%c0_20, %c0_21, %c0_22], %42 {strides = array<i32>} : memref<1x8x128xf32, #tpu.memory_space<vmem>>, vector<1x8x128xf32>,
    } else {
    }
    return
  }
  func.func @transform_0(%arg0: i32, %arg1: i32) -> (i32, i32) {
    %c1_i32 = arith.constant 1 : i32
    %0 = arith.muli %arg0, %c1_i32 : i32
    %1 = arith.addi %0, %arg1 : i32
    %c0_i32 = arith.constant 0 : i32
    %c0_i32_0 = arith.constant 0 : i32
    return %1, %c0_i32 : i32, i32
  }
  func.func @transform_1(%arg0: i32, %arg1: i32) -> (i32, i32) {
    %c1_i32 = arith.constant 1 : i32
    %0 = arith.muli %arg0, %c1_i32 : i32
    %1 = arith.addi %0, %arg1 : i32
    %c0_i32 = arith.constant 0 : i32
    %c0_i32_0 = arith.constant 0 : i32
    return %1, %c0_i32 : i32, i32
  }
  func.func @transform_2(%arg0: i32, %arg1: i32) -> (i32, i32, i32) {
    %c0_i32 = arith.constant 0 : i32
    %c0_i32_0 = arith.constant 0 : i32
    %c0_i32_1 = arith.constant 0 : i32
    return %arg0, %c0_i32, %c0_i32_0 : i32, i32, i32
  }
}

</mosaic_0001>

<bundles_post_ra>
// kernel: tpu_custom_call.1
= control target key start
LH: loop header
LB: loop body
LE: loop exit
PB: predicated region body
PF: predicated region fallthrough
CT: control target
= control target key end

     0   :  { %7 = vsyncpa [#allocation4], 0  ;;  %s845_s0 = inlined_call_operand.hbm [shape: f32[16,128], index: 0, kind: input, shape index: {}]   ;;  %s846_s1 = inlined_call_operand.hbm [shape: bf16[16,128], index: 1, kind: input, shape index: {}]   ;;  %s847_s2 = inlined_call_operand.hbm [shape: f32[2,8,128], index: 2, kind: output, shape index: {}]  }
   0x1   :  { %9 = vsyncpa [#allocation4 + $0x1], 0 }
   0x2   :  { %10 = vsyncpa [#allocation7], 0 }
   0x3   :  { %12 = vsyncpa [#allocation7 + $0x1], 0 }
   0x4   :  { %13 = vsyncpa [#allocation5], 0 }
   0x5   :  { %15 = vsyncpa [#allocation5 + $0x1], 0  ;;  %s626_s9 = smov 0   ;;  %s628_s10 = smov 0  }
   0x6   :  { %s630_s11 = smov 0   ;;  %s632_s12 = smov 0  }
   0x7   :  { %s634_s13 = smov 0   ;;  %s636_s14 = smov 0  }
   0x8 LB: > { %s370_s15 = sadd.s32 4294967295, %s606_s14   ;;  %s371_s16 = sadd.s32 4294967294, %s606_s14   ;;  %s606_s14 = sphi %s636_s14, %s21_s14   ;;  %s602_s13 = sphi %s634_s13, %s867_s13   ;;  %s598_s12 = sphi %s632_s12, %s866_s12   ;;  %s594_s11 = sphi %s630_s11, %s865_s11   ;;  %s590_s10 = sphi %s628_s10, %s864_s10   ;;  %s586_s9 = sphi %s626_s9, %s863_s9  }
   0x9   : > { %s33_s17 = sadd.s32 1, %s602_s13  ;;  %s42_s18 = sadd.s32 1, %s594_s11 }
   0xa   : > { %p35_p0 = scmp.ge.s32.totalorder %s33_s17, 2  ;;  %p49_p1 = scmp.ne.s32.totalorder %s594_s11, %s590_s10 }
   0xb   : > { %p50_p2 = scmp.eq.s32.totalorder %s606_s14, 0  ;;  %p55_p3 = scmp.ne.s32.totalorder %s590_s10, %s586_s9 }
   0xc   : > { %s869_s17 = smov (%p35_p0, %s33_s17), 0  ;;  %p56_p5 = scmp.eq.s32.totalorder %s370_s15, 0 }
   0xd   : > { %p667_p4 = por %p50_p2, %p49_p1  ;;  %s39_s20 = ssub.s32 %s602_s13, %s869_s17 }
   0xe   : > { %p107_p6 = scmp.eq.s32.totalorder %s370_s15, 1  ;;  %p40_p7 = scmp.eq.s32.totalorder %s39_s20, 0 }
   0xf   : > { %p673_p8 = por %p56_p5, %p55_p3  ;;  %p113_p10 = scmp.eq.s32.totalorder %s371_s16, 1 }
  0x10   : > { %p677_p9 = por %p107_p6, %p49_p1  ;;  %p404_p13 = scmp.lt.s32.totalorder %s606_s14, 2 }
  0x11   : > { %s851_s21 = scalar_select %p673_p8, 1, 0 }
  0x12   : > { %s852_s22 = scalar_select %p677_p9, 1, 0 }
  0x13   : > { %s682_s23 = scalar_select %p40_p7, %s594_s11, %s42_s18  }
  0x14   : > { %p684_p11 = por %p113_p10, %p55_p3  ;;  %s691_s25 = sand.u32 1, %s594_s11  }
  0x15   : > { %s374_s26 = sshll.u32 %s691_s25, 3  ;;  %s375_s27 = sshll.u32 %s602_s13, 7 }
  0x16   : > { %s853_s24 = scalar_select %p684_p11, 1, 0 }
  0x17   : > { %s698_s30 = scalar_lea.hbm %s845_s0, %s375_s27  ;;  %s137_s3 = scalar_lea.vmem [#allocation3], %s374_s26 }
  0x18   : > { %s145_s4 = sshll.u32 %s137_s3, 4  ;;  %p704_p0 = pnand %p404_p13, %p667_p4  ;;  %s700_s4 = int_to_ptr.vmem [resolvable:$true] %s145_s4 }
  0x19   : > { %s134_s6 = scalar_lea.sflag [#allocation4], %s691_s25  ;;  %s460_s7 = scalar_lea.hbm %s698_s30, 128 }
  0x1a   : > { %p461_p3 = scmp.ne.s32.totalorder %s698_s30, %s460_s7  ;;  %p462_p5 = pneg %p704_p0 }
  0x1b   : > { %s465_s16 = scalar_lea.hbm %s845_s0, 256  ;;  %p466_p4 = scmp.lt.u32.totalorder %s698_s30, %s845_s0 }
  0x1c   : > { %p463_p6 = pnand %p462_p5, %p461_p3  ;;  %p467_p10 = scmp.lt.u32.totalorder %s465_s16, %s460_s7 }
  0x1d   : > { %p469_p12 = scmp.lt.u32.totalorder %s460_s7, %s698_s30 }
  0x1e   : > { %p464_p7 = pneg %p463_p6  ;;  %p468_p13 = por %p467_p10, %p466_p4 }
  0x20   : > { %p470_p1 = por %p469_p12, %p468_p13 }
  0x22   : > { %p471_p2 = pnand %p470_p1, %p464_p7 }
  0x24   : > { %474 = shalt.err (!%p471_p2)
}
  0x25   : > { %s475_s20 = scalar_lea.vmem %s700_s4, 128  ;;  %s608_s26 = smov [#allocation3]  }
  0x26   : > { %p476_p3 = scmp.ne.s32.totalorder %s700_s4, %s475_s20  ;;  %s480_s27 = sshll.u32 %s608_s26, 4  ;;  %s481_s27 = int_to_ptr.vmem [resolvable:$false] %s480_s27 }
  0x27   : > { %s482_s28 = scalar_lea.vmem %s481_s27, 256  ;;  %p483_p9 = scmp.lt.s32.totalorder %s700_s4, %s481_s27 }
  0x28   : > { %p478_p6 = pnand %p476_p3, %p462_p5  ;;  %p484_p4 = scmp.lt.s32.totalorder %s482_s28, %s475_s20 }
  0x2a   : > { %p479_p11 = pneg %p478_p6  ;;  %p485_p10 = por %p484_p4, %p483_p9 }
  0x2c   : > { %p486_p12 = pnand %p485_p10, %p479_p11 }
  0x2e   : > { %489 = shalt.err (!%p486_p12)
}
  0x2f   : > { %396 = dma.hbm_to_vmem [thread:$0]  (!%p704_p0), %s698_s30, 128, %s700_s4, %s134_s6  }
  0x30   : > { %p855_p1 = scmp.lt.s32.totalorder %s606_s14, 3  ;;  %p856_p2 = scmp.ge.s32.totalorder %s606_s14, 1 }
  0x31   : > { %s376_s3 = sshll.u32 %s691_s25, 2  ;;  %s377_s7 = sshll.u32 %s602_s13, 6 }
  0x32   : > { %p740_p7 = pnand %p856_p2, %p855_p1  ;;  %s749_s16 = scalar_lea.hbm %s846_s1, %s377_s7 }
  0x33   : > { %s156_s18 = scalar_lea.vmem [#allocation6], %s376_s3  ;;  %s153_s30 = scalar_lea.sflag [#allocation7], %s691_s25 }
  0x34   : > { %s857_s29 = scalar_select %p740_p7, 1, 0 }
  0x35   : > { %s164_s19 = sshll.u32 %s156_s18, 4  ;;  %s490_s4 = scalar_lea.hbm %s749_s16, 64  ;;  %s165_s19 = int_to_ptr.vmem [resolvable:$true] %s164_s19 }
  0x36   : > { %p491_p9 = scmp.ne.s32.totalorder %s749_s16, %s490_s4  ;;  %s495_s26 = scalar_lea.hbm %s846_s1, 128 }
  0x37   : > { %p496_p3 = scmp.lt.u32.totalorder %s749_s16, %s846_s1  ;;  %p497_p6 = scmp.lt.u32.totalorder %s495_s26, %s490_s4 }
  0x38   : > { %p493_p11 = pnand %p491_p9, %p462_p5  ;;  %p499_p10 = scmp.lt.u32.totalorder %s490_s4, %s749_s16 }
  0x39   : > { %p498_p4 = por %p497_p6, %p496_p3 }
  0x3a   : > { %p494_p13 = pneg %p493_p11 }
  0x3b   : > { %p500_p12 = por %p499_p10, %p498_p4 }
  0x3d   : > { %p501_p1 = pnand %p500_p12, %p494_p13 }
  0x3f   : > { %504 = shalt.err (!%p501_p1)
}
  0x40   : > { %s505_s25 = scalar_lea.vmem %s165_s19, 64  ;;  %s609_s3 = smov [#allocation6]  }
  0x41   : > { %p506_p2 = scmp.ne.s32.totalorder %s165_s19, %s505_s25  ;;  %s510_s7 = sshll.u32 %s609_s3, 4  ;;  %s511_s7 = int_to_ptr.vmem [resolvable:$false] %s510_s7 }
  0x42   : > { %s512_s8 = scalar_lea.vmem %s511_s7, 128  ;;  %p513_p8 = scmp.lt.s32.totalorder %s165_s19, %s511_s7 }
  0x43   : > { %p508_p9 = pnand %p506_p2, %p462_p5  ;;  %p514_p7 = scmp.lt.s32.totalorder %s512_s8, %s505_s25 }
  0x45   : > { %p509_p11 = pneg %p508_p9  ;;  %p515_p3 = por %p514_p7, %p513_p8 }
  0x47   : > { %p516_p6 = pnand %p515_p3, %p509_p11 }
  0x49   : > { %519 = shalt.err (!%p516_p6)
}
  0x4a   : > { %399 = dma.hbm_to_vmem [thread:$0]  (!%p704_p0), %s749_s16, 64, %s165_s19, %s153_s30  }
  0x4b   : > { %p858_p13 = scmp.ne.s32.totalorder %s857_s29, 0 }
  0x4c   : > { %s774_s15 = sand.u32 (!%p858_p13), 1, %s590_s10   ;;  %p859_p8 = scmp.ne.s32.totalorder (!%p858_p13), %s851_s21, 0 }
  0x4d   : > { %173 = sbr.rel (%p858_p13) target bundleno = 155 (0x9b), region = 28  ;;  %s379_s18 = sshll.u32 (!%p858_p13), %s774_s15, 3 }
  0x4e   : > { %s176_s4 = scalar_lea.sflag (!%p858_p13), [#allocation4], %s774_s15  ;;  %s179_s6 = scalar_lea.vmem (!%p858_p13), [#allocation3], %s379_s18 }
  0x54   : > { %573 = dma.done.wait (%p859_p8), %s176_s4, 128  }
  0x55   : > { %575 = vsyncadd (%p859_p8), %s176_s4, 4294967168  ;;  %s380_s5 = sshll.u32 %s774_s15, 2  ;;  %s185_s29 = scalar_lea.sflag [#allocation7], %s774_s15 }
  0x56   : > { %s188_s16 = scalar_lea.vmem [#allocation6], %s380_s5 }
  0x57   : > { %577 = dma.done.wait (%p859_p8), %s185_s29, 64  }
  0x58   : > { %579 = vsyncadd (%p859_p8), %s185_s29, 4294967232  ;;  %v221_v0 = vld [vmem:[%s179_s6] sm:$0xff]  ;;  %v222_v4 = vld [vmem:[%s188_s16] sm:$0xf]  ;;  %s213_s21 = scalar_lea.vmem [#allocation8], %s379_s18  ;;  %s384_s30 = sshll.u32 %s598_s12, 7 }
  0x59   : > { %v382_v1 = vmul.f32 -1.442695, %v221_v0  ;;  %v223_v6 = vunpack.c.l.bf16 %v222_v4  ;;  %s267_s19 = sshll.u32 %s213_s21, 4  ;;  %s798_s27 = scalar_lea.hbm %s847_s2, %s384_s30  ;;  %s793_s19 = int_to_ptr.vmem [resolvable:$true] %s267_s19 }
  0x5a   : > { %s254_s28 = scalar_lea.sflag [#allocation5], %s774_s15  ;;  %s520_s25 = scalar_lea.vmem %s793_s19, 128 }
  0x5b   : > { %454 = vpow2.f32 %v382_v1  ;;  %vm224_vm0 = vcmp.gt.f32.partialorder %v223_v6, 0.0  ;;  %p521_p0 = scmp.ne.s32.totalorder %s793_s19, %s520_s25  ;;  %p860_p5 = scmp.ne.s32.totalorder %s852_s22, 0 }
  0x5c   : > { %s610_s12 = smov [#allocation8]  }
  0x5d   : > { %p522_p7 = pnand %p521_p0, %p860_p5  ;;  %s524_s3 = sshll.u32 %s610_s12, 4  ;;  %s525_s3 = int_to_ptr.vmem [resolvable:$false] %s524_s3 }
  0x5e   : > { %s526_s7 = scalar_lea.vmem %s525_s3, 256  ;;  %p527_p10 = scmp.lt.s32.totalorder %s793_s19, %s525_s3 }
  0x5f   : > { %p523_p4 = pneg %p522_p7  ;;  %p528_p12 = scmp.lt.s32.totalorder %s526_s7, %s520_s25 }
  0x61   : > { %p529_p1 = por %p528_p12, %p527_p10 }
  0x63   : > { %p530_p2 = pnand %p529_p1, %p523_p4 }
  0x65   : > { %v455_v2 = vpop.eup %454 }
  0x66   : > { %v228_v3 = vadd.f32 1.0, %v455_v2 }
  0x68   : > { %456 = vrcp.f32 %v228_v3 }
  0x72   : > { %v457_v5 = vpop.eup %456 }
  0x73   : > { %v231_v7 = vsub.f32 1.0, %v457_v5 }
  0x75   : > { %v232_v8 = vadd.f32 0.05, %v231_v7 }
  0x77   : > { %v233_v9 = vmin.f32 %v232_v8, 1.0 }
  0x79   : > { %v234_v10 = vsel %vm224_vm0, %v457_v5, %v233_v9  ;;  %v238_v12 = vsub.f32 1.0, %v233_v9 }
  0x7a   : > { %v235_v11 = vmax.f32 %v234_v10, 1e-08 }
  0x7b   : > { %v239_v13 = vmul.f32 %v238_v12, %v238_v12 }
  0x7c   : > { %458 = vlog2.f32 %v235_v11 }
  0x7d   : > { %v240_v14 = vmul.f32 %v239_v13, %v239_v13 }
  0x7f   : > { %v241_v16 = vsel %vm224_vm0, %v231_v7, %v240_v14 }
  0x86   : > { %v459_v15 = vpop.eup %458 }
  0x87   : > { %v237_v17 = vmul.f32 0.6931472, %v459_v15 }
  0x89   : > { %v242_v18 = vmul.f32 %v241_v16, %v237_v17 }
  0x8b   : > { %v251_v19 = vsub.f32 0.0, %v242_v18 }
  0x8d   : > { %252 = vst [vmem:[%s213_s21] sm:$0xff] %v251_v19 }
  0x8e   : > { %533 = shalt.err (!%p530_p2)
}
  0x8f   : > { %s534_s8 = scalar_lea.hbm %s798_s27, 128  ;;  %s538_s4 = scalar_lea.hbm %s847_s2, 256 }
  0x90   : > { %p535_p9 = scmp.ne.s32.totalorder %s798_s27, %s534_s8  ;;  %p539_p6 = scmp.lt.u32.totalorder %s798_s27, %s847_s2 }
  0x91   : > { %p540_p13 = scmp.lt.u32.totalorder %s538_s4, %s534_s8  ;;  %p542_p0 = scmp.lt.u32.totalorder %s534_s8, %s798_s27 }
  0x92   : > { %p536_p11 = pnand %p535_p9, %p860_p5 }
  0x93   : > { %p541_p8 = por %p540_p13, %p539_p6 }
  0x94   : > { %p537_p3 = pneg %p536_p11 }
  0x95   : > { %p543_p7 = por %p542_p0, %p541_p8 }
  0x97   : > { %p544_p4 = pnand %p543_p7, %p537_p3 }
  0x99   : > { %547 = shalt.err (!%p544_p4)
}
  0x9a   : > { %391 = dma.vmem_to_hbm [thread:$0]  (%p860_p5), %s793_s19, 128, %s798_s27, %s254_s28  }
  0x9b PF: > { %s279_s29 = sand.u32 1, %s586_s9   ;;  %p861_p10 = scmp.ne.s32.totalorder %s853_s24, 0 }
  0x9c   : > { %p862_p12 = scmp.ge.s32.totalorder %s606_s14, 2  ;;  %s280_s16 = scalar_lea.sflag [#allocation5], %s279_s29 }
  0x9e   : > { %p401_p1 = pnand %p862_p12, %p861_p10 }
  0xa0   : > { %581 = dma.done.wait (!%p401_p1), %s280_s16, 128  }
  0xa1   : > { %583 = vsyncadd (!%p401_p1), %s280_s16, 4294967168  ;;  %s21_s14 = sadd.s32 1, %s606_s14   ;;  %s863_s9 = smov %s590_s10 }
  0xa2   : > { %p18_p2 = scmp.ge.s32.totalorder %s21_s14, 4   ;;  %s864_s10 = smov %s594_s11 }
  0xa3   : > { %s865_s11 = smov %s682_s23  ;;  %s866_s12 = smov %s602_s13 }
  0xa4   : > { %s867_s13 = smov %s869_s17  ;;  %20 = sbr.rel (!%p18_p2) target bundleno = 8 (0x8), region = 94 }
  0xab   :  { %285 = vsyncpa [#allocation4], 1 }
  0xac   :  { %287 = vsyncpa [#allocation4 + $0x1], 1 }
  0xad   :  { %288 = vsyncpa [#allocation7], 1 }
  0xae   :  { %290 = vsyncpa [#allocation7 + $0x1], 1 }
  0xaf   :  { %291 = vsyncpa [#allocation5], 1 }
  0xb0   :  { %293 = vsyncpa [#allocation5 + $0x1], 1 }

</bundles_post_ra>
